<compile_context>
chip_gen: v6e
topology: v6e:2x2x1
jax: 0.10.0
libtpu: 0.0.40
codegen_flags: <defaults>
</compile_context>

<pallas_src>
import jax
import jax.numpy as jnp
from jax.experimental import pallas as pl
from jax.experimental.pallas import tpu as pltpu

HIDDEN = 128


def critic_kernel(x_ref, u_ref, w1x_ref, w1u_ref, b1_ref, w2_ref, b2_ref,
                  w3r_ref, b3_ref, out_ref):
    # l1 with the concat fused in: cat([x, u], 1) @ W1 == x @ W1[:S] + u @ W1[S:]
    h1 = (jnp.dot(x_ref[...].astype(jnp.bfloat16), w1x_ref[...],
                  preferred_element_type=jnp.float32)
          + jnp.dot(u_ref[...].astype(jnp.bfloat16), w1u_ref[...],
                    preferred_element_type=jnp.float32)
          + b1_ref[...])
    h1 = jnp.maximum(h1, 0.0)

    # l2 + ReLU on the MXU (bf16 operands, f32 accumulation)
    h2 = jnp.dot(h1.astype(jnp.bfloat16), w2_ref[...],
                 preferred_element_type=jnp.float32) + b2_ref[...]
    h2 = jnp.maximum(h2, 0.0)

    # l3: 128 -> 1 as VPU multiply + XLU lane reduction (skips a serially
    # dependent MXU round trip whose result would be a single lane).
    q = jnp.sum(h2 * w3r_ref[...], axis=-1, keepdims=True)
    out_ref[...] = (q + b3_ref[...]).astype(out_ref.dtype)


def critic_forward(x, u, params, *, block_b=1024):
    """x: (B, state_dim), u: (B, action_dim) -> (B, 1) float32."""
    w1x, w1u, b1, w2, b2, w3r, b3 = params
    B, S = x.shape
    A = u.shape[1]

    if B <= block_b:
        bb, Bp = B, B                      # single grid step, block == full array
    else:
        bb = block_b                       # multiple of 8 -> valid sublane tiling
        Bp = pl.cdiv(B, bb) * bb
        if Bp != B:
            x = jnp.pad(x, ((0, Bp - B), (0, 0)))
            u = jnp.pad(u, ((0, Bp - B), (0, 0)))

    grid = (Bp // bb,)
    batch_spec = lambda f: pl.BlockSpec((bb, f), lambda i: (i, 0))
    # Constant index map => weights/biases stay resident in VMEM across steps.
    resident = lambda a: pl.BlockSpec(a.shape, lambda i: (0, 0))

    weight_bytes = sum(int(a.size) * a.dtype.itemsize
                       for a in (w1x, w1u, b1, w2, b2, w3r, b3))
    cost = pl.CostEstimate(
        flops=2 * Bp * ((S + A) * HIDDEN + HIDDEN * HIDDEN + HIDDEN),
        transcendentals=0,
        bytes_accessed=int(x.size + u.size) * 4 + Bp * 4 + weight_bytes,
    )

    out = pl.pallas_call(
        critic_kernel,
        out_shape=jax.ShapeDtypeStruct((Bp, 1), jnp.float32),
        grid=grid,
        in_specs=[batch_spec(S), batch_spec(A),
                  resident(w1x), resident(w1u), resident(b1),
                  resident(w2), resident(b2),
                  resident(w3r), resident(b3)],
        out_specs=pl.BlockSpec((bb, 1), lambda i: (i, 0)),
        compiler_params=pltpu.CompilerParams(
            dimension_semantics=("parallel",)),
        cost_estimate=cost,
    )(x, u, w1x, w1u, b1, w2, b2, w3r, b3)

    return out[:B] if Bp != B else out


def init_params(key, state_dim, action_dim):
    """Mirror PyTorch nn.Linear default init U[-1/sqrt(fan_in), +1/sqrt(fan_in)].
    Weights are stored as (in, out) = transpose of PyTorch's (out, in); the two
    matmul weights are cast to bf16 for half-width DMA, w1 is pre-split into its
    state and action halves so the kernel can fuse the concat.  Biases and the
    final 128-wide row vector stay f32."""
    d_in = state_dim + action_dim
    ks = jax.random.split(key, 6)

    def lin(kw, kb, fan_in, fan_out):
        bound = 1.0 / jnp.sqrt(jnp.float32(fan_in))
        w = jax.random.uniform(kw, (fan_in, fan_out), jnp.float32, -bound, bound)
        b = jax.random.uniform(kb, (1, fan_out), jnp.float32, -bound, bound)
        return w, b

    w1, b1 = lin(ks[0], ks[1], d_in, HIDDEN)
    w2, b2 = lin(ks[2], ks[3], HIDDEN, HIDDEN)
    w3, b3 = lin(ks[4], ks[5], HIDDEN, 1)

    w1x = w1[:state_dim].astype(jnp.bfloat16)
    w1u = w1[state_dim:].astype(jnp.bfloat16)
    w2 = w2.astype(jnp.bfloat16)
    w3r = w3.T.astype(jnp.float32)            # (1, HIDDEN) row vector, VPU dot
    b3 = b3.reshape(1, 1).astype(jnp.float32)
    return (w1x, w1u, b1, w2, b2, w3r, b3)


def reference_forward(x, u, params):
    # Same math in plain JAX (bf16 matmul operands, f32 accumulation).
    w1x, w1u, b1, w2, b2, w3r, b3 = params
    h = (jnp.dot(x.astype(jnp.bfloat16), w1x, preferred_element_type=jnp.float32)
         + jnp.dot(u.astype(jnp.bfloat16), w1u, preferred_element_type=jnp.float32)
         + b1)
    h = jax.nn.relu(h)
    h = jax.nn.relu(jnp.dot(h.astype(jnp.bfloat16), w2,
                            preferred_element_type=jnp.float32) + b2)
    return jnp.sum(h * w3r, axis=-1, keepdims=True) + b3


if __name__ == "__main__":
    key = jax.random.PRNGKey(0)
    k_params, k_x, k_u, k_x2, k_u2 = jax.random.split(key, 5)

    batch, state_dim, action_dim = 8, 16, 8
    params = init_params(k_params, state_dim, action_dim)

    # Small single-block case.
    x = jax.random.normal(k_x, (batch, state_dim), jnp.float32)
    u = jax.random.normal(k_u, (batch, action_dim), jnp.float32)
    out = jax.block_until_ready(critic_forward(x, u, params))
    ref = reference_forward(x, u, params)
    assert out.shape == (batch, 1)
    assert jnp.allclose(out, ref, atol=1e-4, rtol=1e-4), (
        float(jnp.max(jnp.abs(out - ref))))

    # Multi-block (tiled + padded) path, still a small problem.
    b2_ = 200
    x2 = jax.random.normal(k_x2, (b2_, state_dim), jnp.float32)
    u2 = jax.random.normal(k_u2, (b2_, action_dim), jnp.float32)
    out2 = jax.block_until_ready(critic_forward(x2, u2, params, block_b=128))
    ref2 = reference_forward(x2, u2, params)
    assert out2.shape == (b2_, 1)
    assert jnp.allclose(out2, ref2, atol=1e-4, rtol=1e-4), (
        float(jnp.max(jnp.abs(out2 - ref2))))

    # TODO(synk): torch.optim.Adam state (training-time) has no forward-pass
    # equivalent and is intentionally not modeled here.
    print("KERNEL_OK")
</pallas_src>

<mosaic_0001>
module attributes {stable_mosaic.version = 11 : i64} {
  func.func @critic_kernel(%arg0: i32, %arg1: memref<8x16xf32, #tpu.memory_space<vmem>>, %arg2: memref<8x8xf32, #tpu.memory_space<vmem>>, %arg3: memref<16x128xbf16, #tpu.memory_space<vmem>>, %arg4: memref<8x128xbf16, #tpu.memory_space<vmem>>, %arg5: memref<1x128xf32, #tpu.memory_space<vmem>>, %arg6: memref<128x128xbf16, #tpu.memory_space<vmem>>, %arg7: memref<1x128xf32, #tpu.memory_space<vmem>>, %arg8: memref<1x128xf32, #tpu.memory_space<vmem>>, %arg9: memref<1x1xf32, #tpu.memory_space<vmem>>, %arg10: memref<8x1xf32, #tpu.memory_space<vmem>>) attributes {dimension_semantics = [#tpu.dimension_semantics<parallel>], iteration_bounds = array<i64: 1>, scalar_prefetch = 0 : i64, scratch_operands = 0 : i64, tpu.core_type = #tpu.core_type<tc>, window_params = [{transform_indices = @transform_0, window_bounds = array<i64: 8, 16>}, {transform_indices = @transform_1, window_bounds = array<i64: 8, 8>}, {pipeline_mode = #tpu.pipeline_mode<synchronous>, transform_indices = @transform_2, window_bounds = array<i64: 16, 128>}, {pipeline_mode = #tpu.pipeline_mode<synchronous>, transform_indices = @transform_3, window_bounds = array<i64: 8, 128>}, {pipeline_mode = #tpu.pipeline_mode<synchronous>, transform_indices = @transform_4, window_bounds = array<i64: 1, 128>}, {pipeline_mode = #tpu.pipeline_mode<synchronous>, transform_indices = @transform_5, window_bounds = array<i64: 128, 128>}, {pipeline_mode = #tpu.pipeline_mode<synchronous>, transform_indices = @transform_6, window_bounds = array<i64: 1, 128>}, {pipeline_mode = #tpu.pipeline_mode<synchronous>, transform_indices = @transform_7, window_bounds = array<i64: 1, 128>}, {pipeline_mode = #tpu.pipeline_mode<synchronous>, transform_indices = @transform_8, window_bounds = array<i64: 1, 1>}, {transform_indices = @transform_9, window_bounds = array<i64: 8, 1>}]} {
    %c0 = arith.constant 0 : index
    %c0_0 = arith.constant 0 : index
    %0 = vector.load %arg1[%c0, %c0_0] : memref<8x16xf32, #tpu.memory_space<vmem>>, vector<8x16xf32>
    %1 = arith.truncf %0 : vector<8x16xf32> to vector<8x16xbf16>
    %c0_1 = arith.constant 0 : index
    %c0_2 = arith.constant 0 : index
    %2 = vector.load %arg3[%c0_1, %c0_2] : memref<16x128xbf16, #tpu.memory_space<vmem>>, vector<16x128xbf16>
    %cst = arith.constant dense<0.000000e+00> : vector<8x128xf32>
    %3 = tpu.matmul %1, %2, %cst {dimension_numbers = #tpu.dot_dimension_numbers<[1], [0], [0], [1], [0, 0, 1, 1], [], []>} : vector<8x16xbf16>, vector<16x128xbf16>, vector<8x128xf32> -> vector<8x128xf32>
    %c0_3 = arith.constant 0 : index
    %c0_4 = arith.constant 0 : index
    %4 = vector.load %arg2[%c0_3, %c0_4] : memref<8x8xf32, #tpu.memory_space<vmem>>, vector<8x8xf32>
    %5 = arith.truncf %4 : vector<8x8xf32> to vector<8x8xbf16>
    %c0_5 = arith.constant 0 : index
    %c0_6 = arith.constant 0 : index
    %6 = vector.load %arg4[%c0_5, %c0_6] : memref<8x128xbf16, #tpu.memory_space<vmem>>, vector<8x128xbf16>
    %cst_7 = arith.constant dense<0.000000e+00> : vector<8x128xf32>
    %7 = tpu.matmul %5, %6, %cst_7 {dimension_numbers = #tpu.dot_dimension_numbers<[1], [0], [0], [1], [0, 0, 1, 1], [], []>} : vector<8x8xbf16>, vector<8x128xbf16>, vector<8x128xf32> -> vector<8x128xf32>
    %8 = arith.addf %3, %7 : vector<8x128xf32>
    %c0_8 = arith.constant 0 : index
    %c0_9 = arith.constant 0 : index
    %9 = vector.load %arg5[%c0_8, %c0_9] : memref<1x128xf32, #tpu.memory_space<vmem>>, vector<1x128xf32>
    %10 = vector.broadcast %9 : vector<1x128xf32> to vector<8x128xf32>
    %11 = arith.addf %8, %10 : vector<8x128xf32>
    %cst_10 = arith.constant 0.000000e+00 : f32
    %12 = vector.broadcast %cst_10 : f32 to vector<8x128xf32>
    %13 = arith.maximumf %11, %12 : vector<8x128xf32>
    %14 = arith.truncf %13 : vector<8x128xf32> to vector<8x128xbf16>
    %c0_11 = arith.constant 0 : index
    %c0_12 = arith.constant 0 : index
    %15 = vector.load %arg6[%c0_11, %c0_12] : memref<128x128xbf16, #tpu.memory_space<vmem>>, vector<128x128xbf16>
    %cst_13 = arith.constant dense<0.000000e+00> : vector<8x128xf32>
    %16 = tpu.matmul %14, %15, %cst_13 {dimension_numbers = #tpu.dot_dimension_numbers<[1], [0], [0], [1], [0, 0, 1, 1], [], []>} : vector<8x128xbf16>, vector<128x128xbf16>, vector<8x128xf32> -> vector<8x128xf32>
    %c0_14 = arith.constant 0 : index
    %c0_15 = arith.constant 0 : index
    %17 = vector.load %arg7[%c0_14, %c0_15] : memref<1x128xf32, #tpu.memory_space<vmem>>, vector<1x128xf32>
    %18 = vector.broadcast %17 : vector<1x128xf32> to vector<8x128xf32>
    %19 = arith.addf %16, %18 : vector<8x128xf32>
    %cst_16 = arith.constant 0.000000e+00 : f32
    %20 = vector.broadcast %cst_16 : f32 to vector<8x128xf32>
    %21 = arith.maximumf %19, %20 : vector<8x128xf32>
    %c0_17 = arith.constant 0 : index
    %c0_18 = arith.constant 0 : index
    %22 = vector.load %arg8[%c0_17, %c0_18] : memref<1x128xf32, #tpu.memory_space<vmem>>, vector<1x128xf32>
    %23 = vector.broadcast %22 : vector<1x128xf32> to vector<8x128xf32>
    %24 = arith.mulf %21, %23 : vector<8x128xf32>
    %cst_19 = arith.constant dense<0.000000e+00> : vector<8xf32>
    %25 = vector.multi_reduction <add>, %24, %cst_19 [1] : vector<8x128xf32> to vector<8xf32>
    %26 = vector.shape_cast %25 : vector<8xf32> to vector<8x1xf32>
    %c0_20 = arith.constant 0 : index
    %c0_21 = arith.constant 0 : index
    %27 = vector.load %arg9[%c0_20, %c0_21] : memref<1x1xf32, #tpu.memory_space<vmem>>, vector<1x1xf32>
    %28 = vector.broadcast %27 : vector<1x1xf32> to vector<8x1xf32>
    %29 = arith.addf %26, %28 : vector<8x1xf32>
    %c0_22 = arith.constant 0 : index
    %c0_23 = arith.constant 0 : index
    %30 = vector.load %arg10[%c0_22, %c0_23] : memref<8x1xf32, #tpu.memory_space<vmem>>, vector<8x1xf32>
    tpu.vector_store %arg10[%c0_22, %c0_23], %29 {strides = array<i32>} : memref<8x1xf32, #tpu.memory_space<vmem>>, vector<8x1xf32>,
    return
  }
  func.func @transform_0(%arg0: i32) -> (i32, i32) {
    %c0_i32 = arith.constant 0 : i32
    %c0_i32_0 = arith.constant 0 : i32
    return %arg0, %c0_i32 : i32, i32
  }
  func.func @transform_1(%arg0: i32) -> (i32, i32) {
    %c0_i32 = arith.constant 0 : i32
    %c0_i32_0 = arith.constant 0 : i32
    return %arg0, %c0_i32 : i32, i32
  }
  func.func @transform_2(%arg0: i32) -> (i32, i32) {
    %c0_i32 = arith.constant 0 : i32
    %c0_i32_0 = arith.constant 0 : i32
    %c0_i32_1 = arith.constant 0 : i32
    return %c0_i32, %c0_i32_0 : i32, i32
  }
  func.func @transform_3(%arg0: i32) -> (i32, i32) {
    %c0_i32 = arith.constant 0 : i32
    %c0_i32_0 = arith.constant 0 : i32
    %c0_i32_1 = arith.constant 0 : i32
    return %c0_i32, %c0_i32_0 : i32, i32
  }
  func.func @transform_4(%arg0: i32) -> (i32, i32) {
    %c0_i32 = arith.constant 0 : i32
    %c0_i32_0 = arith.constant 0 : i32
    %c0_i32_1 = arith.constant 0 : i32
    return %c0_i32, %c0_i32_0 : i32, i32
  }
  func.func @transform_5(%arg0: i32) -> (i32, i32) {
    %c0_i32 = arith.constant 0 : i32
    %c0_i32_0 = arith.constant 0 : i32
    %c0_i32_1 = arith.constant 0 : i32
    return %c0_i32, %c0_i32_0 : i32, i32
  }
  func.func @transform_6(%arg0: i32) -> (i32, i32) {
    %c0_i32 = arith.constant 0 : i32
    %c0_i32_0 = arith.constant 0 : i32
    %c0_i32_1 = arith.constant 0 : i32
    return %c0_i32, %c0_i32_0 : i32, i32
  }
  func.func @transform_7(%arg0: i32) -> (i32, i32) {
    %c0_i32 = arith.constant 0 : i32
    %c0_i32_0 = arith.constant 0 : i32
    %c0_i32_1 = arith.constant 0 : i32
    return %c0_i32, %c0_i32_0 : i32, i32
  }
  func.func @transform_8(%arg0: i32) -> (i32, i32) {
    %c0_i32 = arith.constant 0 : i32
    %c0_i32_0 = arith.constant 0 : i32
    %c0_i32_1 = arith.constant 0 : i32
    return %c0_i32, %c0_i32_0 : i32, i32
  }
  func.func @transform_9(%arg0: i32) -> (i32, i32) {
    %c0_i32 = arith.constant 0 : i32
    %c0_i32_0 = arith.constant 0 : i32
    return %arg0, %c0_i32 : i32, i32
  }
}

</mosaic_0001>

<bundles_post_ra>
// kernel: tpu_custom_call.1
= control target key start
LH: loop header
LB: loop body
LE: loop exit
PB: predicated region body
PF: predicated region fallthrough
CT: control target
= control target key end

     0   :  { %s594_s0 = inlined_call_operand.hbm [shape: f32[8,16], index: 0, kind: input, shape index: {}]   ;;  %s595_s1 = inlined_call_operand.hbm [shape: f32[8,8], index: 1, kind: input, shape index: {}]   ;;  %s596_s2 = inlined_call_operand.hbm [shape: bf16[16,128], index: 2, kind: input, shape index: {}]   ;;  %s597_s3 = inlined_call_operand.vmem [shape: bf16[8,128], index: 3, kind: input, shape index: {}]   ;;  %s598_s4 = inlined_call_operand.vmem [shape: f32[1,128], index: 4, kind: input, shape index: {}]   ;;  %s599_s5 = inlined_call_operand.hbm [shape: bf16[128,128], index: 5, kind: input, shape index: {}]   ;;  %s600_s6 = inlined_call_operand.vmem [shape: f32[1,128], index: 6, kind: input, shape index: {}]   ;;  %s601_s7 = inlined_call_operand.vmem [shape: f32[1,128], index: 7, kind: input, shape index: {}]   ;;  %s602_s8 = inlined_call_operand.<no memory space> [shape: f32[1,1], index: 8, kind: input, shape index: {}]   ;;  %s603_s9 = inlined_call_operand.vmem [shape: f32[8,1], index: 9, kind: output, shape index: {}]  }
   0x1   :  { %v14_v0 = vstv %s602_s8 }
   0x2   :  { %15 = vst [vmem:[#allocation2] sm:$0x1] %v14_v0 }
   0x3   :  { %16 = vsyncpa [#allocation4], 0 }
   0x4   :  { %17 = vsyncpa [#allocation6], 0 }
   0x5   :  { %18 = vsyncpa [#allocation9], 0  ;;  %s503_s11 = smov [#allocation5]   ;;  %s504_s13 = smov [#allocation3]  }
   0x6   :  { %s35_s12 = sshll.u32 %s503_s11, 4  ;;  %s25_s14 = sshll.u32 %s504_s13, 4  ;;  %s36_s12 = int_to_ptr.vmem [resolvable:$true] %s35_s12  ;;  %s26_s14 = int_to_ptr.vmem [resolvable:$true] %s25_s14 }
   0x7   :  { %s425_s15 = scalar_lea.vmem %s36_s12, 128  ;;  %p430_p1 = scmp.lt.s32.totalorder %s36_s12, %s36_s12 }
   0x8   :  { %p426_p0 = scmp.ne.s32.totalorder %s36_s12, %s425_s15  ;;  %p431_p2 = scmp.lt.s32.totalorder %s425_s15, %s425_s15 }
   0xa   :  { %p432_p3 = por %p431_p2, %p430_p1 }
   0xc   :  { %p433_p4 = pnand %p432_p3, %p426_p0 }
   0xe   :  { %436 = shalt.err (!%p433_p4)
}
   0xf   :  { %38 = dma.hbm_to_vmem [thread:$0]  %s595_s1, 128, %s36_s12, [#allocation6]  }
  0x10   :  { %s445_s8 = scalar_lea.vmem %s26_s14, 128  ;;  %p450_p6 = scmp.lt.s32.totalorder %s26_s14, %s26_s14 }
  0x11   :  { %p446_p5 = scmp.ne.s32.totalorder %s26_s14, %s445_s8  ;;  %p451_p7 = scmp.lt.s32.totalorder %s445_s8, %s445_s8 }
  0x13   :  { %p452_p8 = por %p451_p7, %p450_p6 }
  0x15   :  { %p453_p9 = pnand %p452_p8, %p446_p5 }
  0x17   :  { %456 = shalt.err (!%p453_p9)
}
  0x18   :  { %28 = dma.hbm_to_vmem [thread:$0]  %s594_s0, 128, %s26_s14, [#allocation4]  }
  0x19   :  { %s505_s20 = smov [#allocation7]  }
  0x1a   :  { %s44_s21 = sshll.u32 %s505_s20, 4  ;;  %s45_s21 = int_to_ptr.vmem [resolvable:$true] %s44_s21 }
  0x1b   :  { %s465_s22 = scalar_lea.vmem %s45_s21, 128  ;;  %p470_p11 = scmp.lt.s32.totalorder %s45_s21, %s45_s21 }
  0x1c   :  { %p466_p10 = scmp.ne.s32.totalorder %s45_s21, %s465_s22  ;;  %p471_p12 = scmp.lt.s32.totalorder %s465_s22, %s465_s22 }
  0x1e   :  { %p472_p13 = por %p471_p12, %p470_p11 }
  0x20   :  { %p473_p0 = pnand %p472_p13, %p466_p10 }
  0x22   :  { %476 = shalt.err (!%p473_p0)
}
  0x23   :  { %s506_s1 = smov 64   ;;  %s507_s23 = smov 4  }
  0x24   :  { %50 = dma.hbm_to_vmem [thread:$0]  %s596_s2, 128, %s45_s21, [#allocation6], %s506_s1, %s506_s1, %s507_s23  }
  0x25   :  { %s508_s26 = smov [#allocation8]  }
  0x26   :  { %s60_s27 = sshll.u32 %s508_s26, 4  ;;  %s61_s27 = int_to_ptr.vmem [resolvable:$true] %s60_s27 }
  0x27   :  { %s485_s0 = scalar_lea.vmem %s61_s27, 1024  ;;  %p490_p2 = scmp.lt.s32.totalorder %s61_s27, %s61_s27 }
  0x28   :  { %p486_p1 = scmp.ne.s32.totalorder %s61_s27, %s485_s0  ;;  %p491_p3 = scmp.lt.s32.totalorder %s485_s0, %s485_s0 }
  0x2a   :  { %p492_p4 = por %p491_p3, %p490_p2 }
  0x2c   :  { %p493_p5 = pnand %p492_p4, %p486_p1 }
  0x2e   :  { %496 = shalt.err (!%p493_p5)
}
  0x2f   :  { %66 = dma.hbm_to_vmem [thread:$0]  %s599_s5, 1024, %s61_s27, [#allocation9], %s506_s1, %s506_s1, %s507_s23  }
  0x30   :  { %497 = dma.done.wait [#allocation4], 128  }
  0x31   :  { %498 = vsyncadd [#allocation4], 4294967168 }
  0x32   :  { %499 = dma.done.wait [#allocation6], 256  }
  0x33   :  { %500 = vsyncadd [#allocation6], 4294967040 }
  0x34   :  { %501 = dma.done.wait [#allocation9], 1024  }
  0x35   :  { %502 = vsyncadd [#allocation9], 4294966272  ;;  %v509_v1 = vmov 0.0   ;;  %vm510_vm0 = vmmov 0   ;;  %vm97_vm1 = vcmask 1043456   ;;  %v90_v3 = vld [vmem:[#allocation5] sm:$0xff] }
  0x36   :  { %368 = vmatprep.subr.bf16.mxu1 %v509_v1  ;;  %370 = vmatprep.mubr.msk.bf16.mxu1 %vm510_vm0, %v509_v1  ;;  %v92_v2 = vld [vmem:[%s597_s3] sm:$0xf]  ;;  %v91_v5 = vpack.c.bf16 %v90_v3, %v90_v3  ;;  %v408_v6 = vld [vmem:[#allocation7] sm:$0xff]   ;;  %vm93_vm2 = vcmask 64512   ;;  %v410_v8 = vld [vmem:[#allocation8 + $0x30] sm:$0xff]   ;;  %vm147_vm3 = vcmask 130048  }
  0x37   :  { %380 = vmatprep.subr.bf16.mxu0 %v509_v1  ;;  %396 = vmatprep.mubr.msk.bf16.mxu0 %vm510_vm0, %v509_v1  ;;  %v99_v4 = vsel %vm97_vm1, %v92_v2, 0  ;;  %v409_v7 = vld [vmem:[#allocation8 + $0x38] sm:$0xff]   ;;  %v86_v9 = vld [vmem:[#allocation3] sm:$0xff]  ;;  %v412_v12 = vld [vmem:[#allocation8 + $0x20] sm:$0xff]   ;;  %vm331_vm4 = vcmask 7168  }
  0x38   :  { %369 = vmatpush3.bf16.msra.mxu1 %v99_v4  ;;  %381 = vmatpush3.bf16.msra.mxu0 %v409_v7  ;;  %v411_v10 = vld [vmem:[#allocation8 + $0x28] sm:$0xff]   ;;  %v87_v11 = vpack.c.bf16 %v86_v9, %v86_v9  ;;  %v413_v13 = vld [vmem:[#allocation8 + $0x18] sm:$0xff]   ;;  %v414_v14 = vld [vmem:[#allocation8 + $0x10] sm:$0xff]  }
  0x39   :  { %374 = vmatprep.subr.bf16.mxu1 %v509_v1  ;;  %382 = vmatprep.subr.bf16.mxu0 %v509_v1  ;;  %v415_v15 = vld [vmem:[#allocation8 + $0x8] sm:$0xff]   ;;  %v416_v16 = vld [vmem:[#allocation8] sm:$0xff]  }
  0x3a   :  { %v343_v22 = vld [vmem:[%s598_s4] ss:$0 sm:$0xff] }
  0x3b   :  { %371 = vmatmul.mubr.msk.bf16.vlgmr.msra.gmra.mxu1 %vm93_vm2, %v91_v5  ;;  %v344_v30 = vld [vmem:[%s600_s6] ss:$0 sm:$0xff] }
  0x3c   :  { %375 = vmatpush3.bf16.msra.mxu1 %v408_v6  ;;  %376 = vmatprep.mubr.msk.bf16.mxu1 %vm510_vm0, %v509_v1  ;;  %v353_v34 = vld [vmem:[%s601_s7] ss:$0 sm:$0xff] }
  0x3d   :  { %383 = vmatpush3.bf16.msra.mxu0 %v410_v8  ;;  %v354_v39 = vld [vmem:[#allocation2] ss:$0 sm:$0xff] }
  0x3e   :  { %384 = vmatprep.subr.bf16.mxu0 %v509_v1 }
  0x41   :  { %385 = vmatpush3.bf16.msra.mxu0 %v411_v10 }
  0x42   :  { %386 = vmatprep.subr.bf16.mxu0 %v509_v1 }
  0x43   :  { %377 = vmatmul.mubr.msk.bf16.vlgmr.msra.gmra.mxu1 %vm147_vm3, %v87_v11 }
  0x45   :  { %387 = vmatpush3.bf16.msra.mxu0 %v412_v12 }
  0x46   :  { %388 = vmatprep.subr.bf16.mxu0 %v509_v1 }
  0x49   :  { %389 = vmatpush3.bf16.msra.mxu0 %v413_v13 }
  0x4a   :  { %390 = vmatprep.subr.bf16.mxu0 %v509_v1 }
  0x4d   :  { %391 = vmatpush3.bf16.msra.mxu0 %v414_v14 }
  0x4e   :  { %392 = vmatprep.subr.bf16.mxu0 %v509_v1 }
  0x51   :  { %393 = vmatpush3.bf16.msra.mxu0 %v415_v15 }
  0x52   :  { %394 = vmatprep.subr.bf16.mxu0 %v509_v1 }
  0x55   :  { %395 = vmatpush3.bf16.msra.mxu0 %v416_v16 }
  0xfb   :  { %v135_v17 = vpop.f32.mrf.mxu1 }
  0xfd   :  { %v372_v18 = vpop.f32.mrf.mxu1 }
  0xff   :  { %v138_v19 = vpop.f32.mrf.mxu1 }
 0x101   :  { %v373_v20 = vpop.f32.mrf.mxu1 }
 0x103   :  { %v185_v21 = vpop.f32.mrf.mxu1 }
 0x104   :  { %v186_v23 = vadd.f32 %v185_v21, %v135_v17 }
 0x105   :  { %v378_v24 = vpop.f32.mrf.mxu1 }
 0x106   :  { %v198_v25 = vadd.f32 %v343_v22, %v186_v23 }
 0x107   :  { %v188_v26 = vpop.f32.mrf.mxu1 }
 0x108   :  { %v199_v27 = vmax.f32 %v198_v25, 0.0 }
 0x109   :  { %v379_v28 = vpop.f32.mrf.mxu1 }
 0x10a   :  { %v200_v29 = vpack.c.bf16 %v199_v27, %v199_v27 }
 0x10c   :  { %397 = vmatmul.mubr.bf16.vlgmr.msra.gmra.mxu0 %v200_v29 }
 0x1cc   :  { %v306_v31 = vpop.f32.mrf.mxu0 }
 0x1cd   :  { %v307_v32 = vadd.f32 %v344_v30, %v306_v31 }
 0x1ce   :  { %v398_v33 = vpop.f32.mrf.mxu0 }
 0x1cf   :  { %v312_v35 = vmax.f32 %v307_v32, 0.0 }
 0x1d0   :  { %v309_v36 = vpop.f32.mrf.mxu0 }
 0x1d1   :  { %v320_v37 = vmul.f32 %v353_v34, %v312_v35 }
 0x1d2   :  { %v399_v38 = vpop.f32.mrf.mxu0 }
 0x1d3   :  { %321 = vadd.xlane.f32.xlu0 %v320_v37 }
 0x25c   :  { %v322_v40 = vpop.xlane.xlu0 %321 }
 0x25d   :  { %v330_v41 = vadd.f32 %v354_v39, %v322_v40 }
 0x25f   :  { %332 = vst.msk [vmem:[%s603_s9] sm:$0xff] %vm331_vm4, %v330_v41 }
 0x260   :  { %337 = vsyncpa [#allocation4], 1 }
 0x261   :  { %338 = vsyncpa [#allocation6], 1 }
 0x262   :  { %339 = vsyncpa [#allocation9], 1 }

</bundles_post_ra>
